<compile_context>
chip_gen: v7x
topology: tpu7x:2x2x1
jax: 0.10.0
libtpu: 0.0.40
codegen_flags: <defaults>
</compile_context>

<pallas_src>
import jax
import jax.numpy as jnp
from jax.experimental import pallas as pl
from jax.experimental.pallas import tpu as pltpu


_LANE = 128          # lane quantum (last block dim must be a multiple of this)
_CHUNK = 512         # in-kernel strip size along the batch/lane axis
_MAX_TILE_B = 4096   # per-grid-step batch tile upper bound
_TARGET_STEPS = 4    # aim for ~4 grid steps (v7x 2-TC sharding + pipelining)


def actor_kernel(xt_ref, w1t_ref, b1_ref, w2_ref, b2_ref, o_ref):
    # xt_ref : (obs, TILE_B)     VMEM   batch on lanes
    # w1t_ref: (hidden, obs)     VMEM   layer-1 weight, (out, in) layout
    # b1_ref : (hidden, 1)       VMEM
    # w2_ref : (hidden, action)  VMEM   layer-2 weight, (in, out) layout
    # b2_ref : (action,)         SMEM   scalar bias(es)
    # o_ref  : (action, TILE_B)  VMEM   batch on lanes -> full-lane stores
    obs_size = xt_ref.shape[0]
    action_size = o_ref.shape[0]
    tile_b = xt_ref.shape[1]

    # Strip-mine the lane axis so intermediates stay small (wrapper guarantees
    # tile_b is a multiple of _CHUNK whenever tile_b > _CHUNK).
    chunk = min(_CHUNK, tile_b)
    for c in range(0, tile_b, chunk):                         # static, <= 8 iters
        xs = xt_ref[:, c:c + chunk]                           # (obs, chunk)

        # ---- Layer 1: Linear(obs -> hidden) + ReLU, pure VPU ----
        # h[j, b] = sum_k w1t[j, k] * x[k, b] + b1[j]; bias folded into k=0 FMA.
        h = w1t_ref[:, 0:1] * xs[0:1, :] + b1_ref[...]        # (hidden, chunk)
        for k in range(1, obs_size):                          # static, tiny
            h = h + w1t_ref[:, k:k + 1] * xs[k:k + 1, :]
        h = jnp.maximum(h, 0.0)

        # ---- Layer 2: Linear(hidden -> action) + Tanh ----
        # N=action is tiny: VPU multiply + cross-sublane reduce keeps the result
        # lane-dense in batch (no 1-lane MXU output, no masked stores).
        for a in range(action_size):                          # static, tiny
            ya = jnp.sum(w2_ref[:, a:a + 1] * h, axis=0, keepdims=True)  # (1, chunk)
            o_ref[a:a + 1, c:c + chunk] = jnp.tanh(ya + b2_ref[a]).astype(o_ref.dtype)


def _round_up(x, m):
    return pl.cdiv(x, m) * m


def _pick_tile_b(B, tile_b=None):
    """Choose (tile_b, padded_B). tile_b is a multiple of 128 (and of _CHUNK
    when > _CHUNK); padded_B is a multiple of tile_b."""
    bp128 = _round_up(B, _LANE)
    if tile_b is None:
        if bp128 <= 2 * _LANE:
            tile_b = bp128                      # small batch: single tile, no pad waste
        else:
            t = _round_up(pl.cdiv(bp128, _TARGET_STEPS), _LANE)
            tile_b = max(_LANE, min(_MAX_TILE_B, t))
    tile_b = _round_up(int(tile_b), _LANE)
    if tile_b > _CHUNK:
        tile_b = _round_up(tile_b, _CHUNK)      # kernel strips require this
    bp = _round_up(bp128, tile_b)
    return tile_b, bp


def actor_forward_lanes(xt, w1t, b1c, w2c, b2s, *, tile_b=None):
    """Latency-path entry: batch-on-lanes I/O, no wrapper layout HLOs.

    xt  : (obs, Bp)        float32, Bp a multiple of 128
    w1t : (hidden, obs)    float32   (= layer-1 weight in (out, in) layout)
    b1c : (hidden, 1)      float32
    w2c : (hidden, action) float32   (in, out) layout
    b2s : (action,)        float32
    returns (action, Bp) float32
    """
    obs, bp = xt.shape
    hidden = w1t.shape[0]
    action = w2c.shape[1]
    assert bp % _LANE == 0, "batch (lane) extent must be a multiple of 128"

    tile_b, bp2 = _pick_tile_b(bp, tile_b)
    assert bp2 == bp, "xt batch extent must already be a multiple of the tile"
    grid = (bp // tile_b,)

    cost = pl.CostEstimate(
        flops=2 * bp * (obs * hidden + hidden * action),
        transcendentals=bp * action,
        bytes_accessed=4 * (obs * bp + obs * hidden + hidden
                            + hidden * action + action + action * bp),
    )

    return pl.pallas_call(
        actor_kernel,
        out_shape=jax.ShapeDtypeStruct((action, bp), jnp.float32),
        grid=grid,
        in_specs=[
            pl.BlockSpec((obs, tile_b), lambda i: (0, i)),       # x tile, batch on lanes
            pl.BlockSpec((hidden, obs), lambda i: (0, 0)),       # w1^T, VMEM-resident
            pl.BlockSpec((hidden, 1), lambda i: (0, 0)),         # b1,  VMEM-resident
            pl.BlockSpec((hidden, action), lambda i: (0, 0)),    # w2,  VMEM-resident
            pl.BlockSpec(memory_space=pltpu.MemorySpace.SMEM),   # b2 scalars in SMEM
        ],
        out_specs=pl.BlockSpec((action, tile_b), lambda i: (0, i)),
        compiler_params=pltpu.CompilerParams(
            # batch axis is embarrassingly parallel -> megacore / v7x 2-TC sharding
            dimension_semantics=("parallel",),
        ),
        cost_estimate=cost,
    )(xt, w1t, b1c, w2c, b2s)


def actor_forward(x, w1, b1, w2, b2, *, tile_b=None):
    """tanh(relu(x @ w1 + b1) @ w2 + b2)

    x  : (B, obs)          float32
    w1 : (obs, hidden)     float32   (in, out) layout (= PyTorch weight.T)
    b1 : (hidden,)         float32
    w2 : (hidden, action)  float32   (in, out) layout
    b2 : (action,)         float32
    returns (B, action) float32
    """
    B, obs = x.shape
    hidden = w1.shape[1]
    action = w2.shape[1]

    tile_b, bp = _pick_tile_b(B, tile_b)

    # Minimal layout plumbing (batch -> lane axis).  Pad only when needed.
    xt = x.T.astype(jnp.float32)                      # (obs, B)
    if bp != B:
        xt = jnp.pad(xt, ((0, 0), (0, bp - B)))       # zero pad: no NaN/Inf risk
    w1t = w1.T.astype(jnp.float32)                    # (hidden, obs)
    b1c = b1.reshape(hidden, 1).astype(jnp.float32)
    w2c = w2.astype(jnp.float32)                      # (hidden, action)
    b2s = b2.reshape(action).astype(jnp.float32)

    out_t = actor_forward_lanes(xt, w1t, b1c, w2c, b2s, tile_b=tile_b)  # (action, bp)

    out = out_t[:, :B]
    if action == 1:
        return out.reshape(B, action)                 # metadata-only (no transpose op)
    return out.T


def init_actor_params(key, obs_size, action_size, hidden=128):
    # PyTorch nn.Linear default init: U(-1/sqrt(fan_in), 1/sqrt(fan_in))
    k1, k2, k3, k4 = jax.random.split(key, 4)
    lim1 = 1.0 / jnp.sqrt(jnp.float32(obs_size))
    lim2 = 1.0 / jnp.sqrt(jnp.float32(hidden))
    w1 = jax.random.uniform(k1, (obs_size, hidden), jnp.float32, -lim1, lim1)
    b1 = jax.random.uniform(k2, (hidden,), jnp.float32, -lim1, lim1)
    w2 = jax.random.uniform(k3, (hidden, action_size), jnp.float32, -lim2, lim2)
    b2 = jax.random.uniform(k4, (action_size,), jnp.float32, -lim2, lim2)
    return w1, b1, w2, b2


def actor_reference(x, w1, b1, w2, b2):
    h = jnp.maximum(x @ w1 + b1, 0.0)
    return jnp.tanh(h @ w2 + b2)


if __name__ == "__main__":
    # MountainCarContinuous-v0: obs_size=2, action_size=1
    obs_size, action_size, hidden = 2, 1, 128

    key = jax.random.PRNGKey(0)
    kx, kp, kx2 = jax.random.split(key, 3)
    w1, b1, w2, b2 = init_actor_params(kp, obs_size, action_size, hidden)

    # Small latency-path batch (single grid step, no pad waste).
    batch = 8
    x = jax.random.normal(kx, (batch, obs_size), jnp.float32)
    out = jax.block_until_ready(actor_forward(x, w1, b1, w2, b2))
    ref = actor_reference(x, w1, b1, w2, b2)
    assert out.shape == (batch, action_size)
    assert jnp.allclose(out, ref, atol=1e-5, rtol=1e-5)

    # Larger batch: exercises multi-step grid, padding, and the reshape path.
    batch2 = 640
    x2 = jax.random.normal(kx2, (batch2, obs_size), jnp.float32)
    out2 = jax.block_until_ready(actor_forward(x2, w1, b1, w2, b2))
    ref2 = actor_reference(x2, w1, b1, w2, b2)
    assert out2.shape == (batch2, action_size)
    assert jnp.allclose(out2, ref2, atol=1e-5, rtol=1e-5)

    print("KERNEL_OK")
</pallas_src>

<mosaic_0001>
module attributes {stable_mosaic.version = 11 : i64} {
  func.func @actor_kernel(%arg0: i32, %arg1: memref<2x128xf32, #tpu.memory_space<vmem>>, %arg2: memref<128x2xf32, #tpu.memory_space<vmem>>, %arg3: memref<128x1xf32, #tpu.memory_space<vmem>>, %arg4: memref<128x1xf32, #tpu.memory_space<vmem>>, %arg5: memref<1xf32, #tpu.memory_space<smem>>, %arg6: memref<1x128xf32, #tpu.memory_space<vmem>>) attributes {dimension_semantics = [#tpu.dimension_semantics<parallel>], iteration_bounds = array<i64: 1>, scalar_prefetch = 0 : i64, scratch_operands = 0 : i64, tpu.core_type = #tpu.core_type<tc>, window_params = [{transform_indices = @transform_0, window_bounds = array<i64: 2, 128>}, {pipeline_mode = #tpu.pipeline_mode<synchronous>, transform_indices = @transform_1, window_bounds = array<i64: 128, 2>}, {pipeline_mode = #tpu.pipeline_mode<synchronous>, transform_indices = @transform_2, window_bounds = array<i64: 128, 1>}, {pipeline_mode = #tpu.pipeline_mode<synchronous>, transform_indices = @transform_3, window_bounds = array<i64: 128, 1>}, {transform_indices = @transform_4, window_bounds = array<i64: 1>}, {transform_indices = @transform_5, window_bounds = array<i64: 1, 128>}]} {
    %c0 = arith.constant 0 : index
    %c0_0 = arith.constant 0 : index
    %0 = vector.load %arg1[%c0, %c0_0] : memref<2x128xf32, #tpu.memory_space<vmem>>, vector<2x128xf32>
    %c0_1 = arith.constant 0 : index
    %c0_2 = arith.constant 0 : index
    %1 = vector.load %arg2[%c0_1, %c0_2] : memref<128x2xf32, #tpu.memory_space<vmem>>, vector<128x1xf32>
    %2 = vector.extract_strided_slice %0 {offsets = [0, 0], sizes = [1, 128], strides = [1, 1]} : vector<2x128xf32> to vector<1x128xf32>
    %3 = vector.broadcast %1 : vector<128x1xf32> to vector<128x128xf32>
    %4 = vector.broadcast %2 : vector<1x128xf32> to vector<128x128xf32>
    %5 = arith.mulf %3, %4 : vector<128x128xf32>
    %c0_3 = arith.constant 0 : index
    %c0_4 = arith.constant 0 : index
    %6 = vector.load %arg3[%c0_3, %c0_4] : memref<128x1xf32, #tpu.memory_space<vmem>>, vector<128x1xf32>
    %7 = vector.broadcast %6 : vector<128x1xf32> to vector<128x128xf32>
    %8 = arith.addf %5, %7 : vector<128x128xf32>
    %c0_5 = arith.constant 0 : index
    %c1 = arith.constant 1 : index
    %9 = vector.load %arg2[%c0_5, %c1] : memref<128x2xf32, #tpu.memory_space<vmem>>, vector<128x1xf32>
    %10 = vector.extract_strided_slice %0 {offsets = [1, 0], sizes = [1, 128], strides = [1, 1]} : vector<2x128xf32> to vector<1x128xf32>
    %11 = vector.broadcast %9 : vector<128x1xf32> to vector<128x128xf32>
    %12 = vector.broadcast %10 : vector<1x128xf32> to vector<128x128xf32>
    %13 = arith.mulf %11, %12 : vector<128x128xf32>
    %14 = arith.addf %8, %13 : vector<128x128xf32>
    %cst = arith.constant 0.000000e+00 : f32
    %15 = vector.broadcast %cst : f32 to vector<128x128xf32>
    %16 = arith.maximumf %14, %15 : vector<128x128xf32>
    %c0_6 = arith.constant 0 : index
    %c0_7 = arith.constant 0 : index
    %17 = vector.load %arg4[%c0_6, %c0_7] : memref<128x1xf32, #tpu.memory_space<vmem>>, vector<128x1xf32>
    %18 = vector.broadcast %17 : vector<128x1xf32> to vector<128x128xf32>
    %19 = arith.mulf %18, %16 : vector<128x128xf32>
    %cst_8 = arith.constant dense<0.000000e+00> : vector<128xf32>
    %20 = vector.multi_reduction <add>, %19, %cst_8 [0] : vector<128x128xf32> to vector<128xf32>
    %21 = vector.shape_cast %20 : vector<128xf32> to vector<1x128xf32>
    %c0_9 = arith.constant 0 : index
    %22 = memref.load %arg5[%c0_9] : memref<1xf32, #tpu.memory_space<smem>>
    %23 = vector.broadcast %22 : f32 to vector<1x128xf32>
    %24 = arith.addf %21, %23 : vector<1x128xf32>
    %25 = math.tanh %24 : vector<1x128xf32>
    %c0_10 = arith.constant 0 : index
    %c0_11 = arith.constant 0 : index
    %26 = vector.load %arg6[%c0_10, %c0_11] : memref<1x128xf32, #tpu.memory_space<vmem>>, vector<1x128xf32>
    tpu.vector_store %arg6[%c0_10, %c0_11], %25 {strides = array<i32>} : memref<1x128xf32, #tpu.memory_space<vmem>>, vector<1x128xf32>,
    return
  }
  func.func @transform_0(%arg0: i32) -> (i32, i32) {
    %c0_i32 = arith.constant 0 : i32
    %c0_i32_0 = arith.constant 0 : i32
    return %c0_i32, %arg0 : i32, i32
  }
  func.func @transform_1(%arg0: i32) -> (i32, i32) {
    %c0_i32 = arith.constant 0 : i32
    %c0_i32_0 = arith.constant 0 : i32
    %c0_i32_1 = arith.constant 0 : i32
    return %c0_i32, %c0_i32_0 : i32, i32
  }
  func.func @transform_2(%arg0: i32) -> (i32, i32) {
    %c0_i32 = arith.constant 0 : i32
    %c0_i32_0 = arith.constant 0 : i32
    %c0_i32_1 = arith.constant 0 : i32
    return %c0_i32, %c0_i32_0 : i32, i32
  }
  func.func @transform_3(%arg0: i32) -> (i32, i32) {
    %c0_i32 = arith.constant 0 : i32
    %c0_i32_0 = arith.constant 0 : i32
    %c0_i32_1 = arith.constant 0 : i32
    return %c0_i32, %c0_i32_0 : i32, i32
  }
  func.func @transform_4(%arg0: i32) -> i32 {
    %c0_i32 = arith.constant 0 : i32
    %c0_i32_0 = arith.constant 0 : i32
    return %c0_i32 : i32
  }
  func.func @transform_5(%arg0: i32) -> (i32, i32) {
    %c0_i32 = arith.constant 0 : i32
    %c0_i32_0 = arith.constant 0 : i32
    return %c0_i32, %arg0 : i32, i32
  }
}

</mosaic_0001>

<bundles_post_ra>
// kernel: tpu_custom_call.1
= control target key start
LH: loop header
LB: loop body
LE: loop exit
PB: predicated region body
PF: predicated region fallthrough
CT: control target
= control target key end

     0   :  { %v555_v2 = vmov 1   ;;  %v556_v3 = vmov 0   ;;  %s898_s0 = inlined_call_operand.vmem [shape: f32[2,128], index: 0, kind: input, shape index: {}]   ;;  %s899_s1 = inlined_call_operand.vmem [shape: f32[128,2], index: 1, kind: input, shape index: {}]   ;;  %s900_s2 = inlined_call_operand.vmem [shape: f32[128,1], index: 2, kind: input, shape index: {}]   ;;  %s901_s3 = inlined_call_operand.vmem [shape: f32[128,1], index: 3, kind: input, shape index: {}]   ;;  %s902_s4 = inlined_call_operand.<no memory space> [shape: f32[1], index: 4, kind: input, shape index: {}]   ;;  %s903_s5 = inlined_call_operand.hbm [shape: f32[1,128], index: 5, kind: output, shape index: {}]  }
   0x1   :  { %v591_v0 = vld [vmem:[%s899_s1 + $0x10] sm:$0xff]  ;;  %v23_v1 = vld [vmem:[%s899_s1] sm:$0xff]  ;;  %523 = vset.pattern.permute.xlu0 %v555_v2  ;;  %522 = vset.pattern.permute.xlu1 %v556_v3  ;;  %v26_v4 = vld [vmem:[%s899_s1 + $0x18] sm:$0xff] }
   0x2   :  { %51 = vperm.xlu1 %522, %v591_v0   ;;  %252 = vperm.xlu0 %523, %v23_v1   ;;  %v605_v5 = vld [vmem:[%s899_s1 + $0x28] sm:$0xff]  ;;  %v612_v6 = vld [vmem:[%s899_s1 + $0x38] sm:$0xff]  ;;  %v27_v9 = vld [vmem:[%s899_s1 + $0x20] sm:$0xff] }
   0x3   :  { %v24_v7 = vld [vmem:[%s899_s1 + $0x8] sm:$0xff] }
   0x4   :  { %v621_v8 = vld [vmem:[%s899_s1 + $0x48] sm:$0xff] }
   0x6   :  { %56 = vperm.xlu1 %522, %v26_v4   ;;  %264 = vperm.xlu0 %523, %v26_v4  }
   0xa   :  { %66 = vperm.xlu1 %522, %v605_v5   ;;  %525 = vset.pattern.permute.xlu0 %v556_v3 }
   0xb   :  { %41 = vperm.xlu0 %525, %v23_v1  }
   0xe   :  { %76 = vperm.xlu1 %522, %v612_v6  }
   0xf   :  { %46 = vperm.xlu0 %525, %v24_v7  }
  0x10   :  { %11 = vsyncpa [#allocation4], 0  ;;  %v630_v10 = vld [vmem:[%s899_s1 + $0x58] sm:$0xff]  ;;  %v635_v11 = vld [vmem:[%s899_s1 + $0x30] sm:$0xff]  ;;  %v119_v61 = vlaneseq  ;;  %s557_s11 = smov [#allocation3]  }
  0x11   :  { %v642_v12 = vld [vmem:[%s899_s1 + $0x68] sm:$0xff]  ;;  %v647_v13 = vld [vmem:[%s899_s1 + $0x40] sm:$0xff]  ;;  %v654_v14 = vld [vmem:[%s899_s1 + $0x78] sm:$0xff]  ;;  %s511_s12 = sshll.u32 %s557_s11, 4  ;;  %s512_s12 = int_to_ptr.vmem [resolvable:$true] %s511_s12 }
  0x12   :  { %86 = vperm.xlu1 %522, %v621_v8   ;;  %v659_v15 = vld [vmem:[%s899_s1 + $0x50] sm:$0xff]  ;;  %v140_v16 = vld [vmem:[%s900_s2 + $0x8] sm:$0xff]  ;;  %v669_v17 = vld [vmem:[%s899_s1 + $0x60] sm:$0xff]  ;;  %s531_s13 = scalar_lea.vmem %s512_s12, 16  ;;  %s535_s14 = scalar_lea.vmem %s512_s12, 32 }
  0x13   :  { %61 = vperm.xlu0 %525, %v27_v9   ;;  %v142_v18 = vld [vmem:[%s900_s2 + $0x18] sm:$0xff]  ;;  %v678_v19 = vld [vmem:[%s899_s1 + $0x70] sm:$0xff]  ;;  %v144_v20 = vld [vmem:[%s900_s2 + $0x28] sm:$0xff]  ;;  %p532_p0 = scmp.ne.s32.totalorder %s512_s12, %s531_s13  ;;  %p536_p1 = scmp.lt.s32.totalorder %s512_s12, %s512_s12 }
  0x14   :  { %v139_v21 = vld [vmem:[%s900_s2] sm:$0xff]  ;;  %v146_v22 = vld [vmem:[%s900_s2 + $0x38] sm:$0xff]  ;;  %v141_v23 = vld [vmem:[%s900_s2 + $0x10] sm:$0xff]  ;;  %p537_p2 = scmp.lt.s32.totalorder %s535_s14, %s531_s13 }
  0x15   :  { %v148_v24 = vld [vmem:[%s900_s2 + $0x48] sm:$0xff]  ;;  %v143_v25 = vld [vmem:[%s900_s2 + $0x20] sm:$0xff]  ;;  %v150_v26 = vld [vmem:[%s900_s2 + $0x58] sm:$0xff] }
  0x16   :  { %96 = vperm.xlu1 %522, %v630_v10   ;;  %v145_v27 = vld [vmem:[%s900_s2 + $0x30] sm:$0xff]  ;;  %v152_v28 = vld [vmem:[%s900_s2 + $0x68] sm:$0xff]  ;;  %v147_v29 = vld [vmem:[%s900_s2 + $0x40] sm:$0xff]  ;;  %p538_p3 = por %p537_p2, %p536_p1 }
  0x17   :  { %71 = vperm.xlu0 %525, %v635_v11   ;;  %v154_v30 = vld [vmem:[%s900_s2 + $0x78] sm:$0xff]  ;;  %v149_v31 = vld [vmem:[%s900_s2 + $0x50] sm:$0xff]  ;;  %v151_v32 = vld [vmem:[%s900_s2 + $0x60] sm:$0xff] }
  0x18   :  { %v153_v33 = vld [vmem:[%s900_s2 + $0x70] sm:$0xff]  ;;  %v367_v34 = vld [vmem:[%s901_s3] sm:$0xff]  ;;  %v368_v36 = vld [vmem:[%s901_s3 + $0x8] sm:$0xff]  ;;  %p539_p4 = pnand %p538_p3, %p532_p0 }
  0x19   :  { %v369_v35 = vld [vmem:[%s901_s3 + $0x10] sm:$0xff]  ;;  %v370_v37 = vld [vmem:[%s901_s3 + $0x18] sm:$0xff]  ;;  %v371_v38 = vld [vmem:[%s901_s3 + $0x20] sm:$0xff] }
  0x1a   :  { %106 = vperm.xlu1 %522, %v642_v12   ;;  %v372_v39 = vld [vmem:[%s901_s3 + $0x28] sm:$0xff]  ;;  %v373_v40 = vld [vmem:[%s901_s3 + $0x30] sm:$0xff]  ;;  %v374_v41 = vld [vmem:[%s901_s3 + $0x38] sm:$0xff] }
  0x1b   :  { %81 = vperm.xlu0 %525, %v647_v13   ;;  %v375_v42 = vld [vmem:[%s901_s3 + $0x40] sm:$0xff]  ;;  %v376_v43 = vld [vmem:[%s901_s3 + $0x48] sm:$0xff]  ;;  %v377_v44 = vld [vmem:[%s901_s3 + $0x50] sm:$0xff] }
  0x1c   :  { %v378_v45 = vld [vmem:[%s901_s3 + $0x58] sm:$0xff]  ;;  %v379_v46 = vld [vmem:[%s901_s3 + $0x60] sm:$0xff]  ;;  %v381_v47 = vld [vmem:[%s901_s3 + $0x70] sm:$0xff] }
  0x1d   :  { %v380_v48 = vld [vmem:[%s901_s3 + $0x68] sm:$0xff]  ;;  %v382_v51 = vld [vmem:[%s901_s3 + $0x78] sm:$0xff] }
  0x1e   :  { %116 = vperm.xlu1 %522, %v654_v14  }
  0x1f   :  { %91 = vperm.xlu0 %525, %v659_v15  }
  0x22   :  { %162 = vperm.xlu1 %522, %v140_v16  }
  0x23   :  { %101 = vperm.xlu0 %525, %v669_v17  }
  0x26   :  { %172 = vperm.xlu1 %522, %v142_v18  }
  0x27   :  { %111 = vperm.xlu0 %525, %v678_v19  }
  0x2a   :  { %182 = vperm.xlu1 %522, %v144_v20  }
  0x2b   :  { %157 = vperm.xlu0 %525, %v139_v21  }
  0x2e   :  { %192 = vperm.xlu1 %522, %v146_v22  }
  0x2f   :  { %167 = vperm.xlu0 %525, %v141_v23  }
  0x32   :  { %202 = vperm.xlu1 %522, %v148_v24  }
  0x33   :  { %177 = vperm.xlu0 %525, %v143_v25  }
  0x36   :  { %212 = vperm.xlu1 %522, %v150_v26  }
  0x37   :  { %187 = vperm.xlu0 %525, %v145_v27  }
  0x3a   :  { %222 = vperm.xlu1 %522, %v152_v28  }
  0x3b   :  { %197 = vperm.xlu0 %525, %v147_v29  }
  0x3e   :  { %232 = vperm.xlu1 %522, %v154_v30  }
  0x3f   :  { %207 = vperm.xlu0 %525, %v149_v31  }
  0x42   :  { %524 = vset.pattern.permute.xlu1 %v555_v2 }
  0x43   :  { %256 = vperm.xlu1 %524, %v24_v7   ;;  %217 = vperm.xlu0 %525, %v151_v32  }
  0x47   :  { %260 = vperm.xlu1 %524, %v591_v0   ;;  %227 = vperm.xlu0 %525, %v153_v33   ;;  %v120_v0 = vshrl.u32 %v119_v61, 7 }
  0x49   :  { %v317_v4 = vsub.s32 1, %v120_v0 }
  0x4b   :  { %268 = vperm.xlu1 %524, %v27_v9   ;;  %385 = vperm.xlu0 %525, %v367_v34  }
  0x4f   :  { %526 = vset.pattern.permute.xlu1 %v556_v3  ;;  %395 = vperm.xlu0 %525, %v369_v35  }
  0x50   :  { %390 = vperm.xlu1 %526, %v368_v36  }
  0x53   :  { %400 = vperm.xlu0 %525, %v370_v37  }
  0x54   :  { %527 = vset.pattern.permute.xlu1 %v555_v2 }
  0x55   :  { %272 = vperm.xlu1 %527, %v605_v5  }
  0x57   :  { %405 = vperm.xlu0 %525, %v371_v38  }
  0x59   :  { %276 = vperm.xlu1 %527, %v635_v11  }
  0x5b   :  { %410 = vperm.xlu0 %525, %v372_v39  }
  0x5d   :  { %280 = vperm.xlu1 %527, %v612_v6   ;;  %v22_v6 = vld [vmem:[%s898_s0] sm:$0x3] }
  0x5e   :  { %v810_v9 = vrot.slane %v22_v6, %v317_v4 }
  0x5f   :  { %415 = vperm.xlu0 %525, %v373_v40  }
  0x61   :  { %284 = vperm.xlu1 %527, %v647_v13  }
  0x63   :  { %420 = vperm.xlu0 %525, %v374_v41  }
  0x65   :  { %288 = vperm.xlu1 %527, %v621_v8  }
  0x67   :  { %425 = vperm.xlu0 %525, %v375_v42  }
  0x69   :  { %292 = vperm.xlu1 %527, %v659_v15  }
  0x6b   :  { %430 = vperm.xlu0 %525, %v376_v43  }
  0x6d   :  { %296 = vperm.xlu1 %527, %v630_v10  }
  0x6f   :  { %435 = vperm.xlu0 %525, %v377_v44  }
  0x71   :  { %300 = vperm.xlu1 %527, %v669_v17  }
  0x73   :  { %440 = vperm.xlu0 %525, %v378_v45  }
  0x75   :  { %304 = vperm.xlu1 %527, %v642_v12  }
  0x77   :  { %445 = vperm.xlu0 %525, %v379_v46  }
  0x79   :  { %308 = vperm.xlu1 %527, %v678_v19  }
  0x7b   :  { %455 = vperm.xlu0 %525, %v381_v47  }
  0x7d   :  { %312 = vperm.xlu1 %527, %v654_v14  }
  0x81   :  { %v52_v49 = vpop.permute.xlu1 %51  ;;  %528 = vset.pattern.permute.xlu1 %v556_v3  ;;  %v253_v50 = vpop.permute.xlu0 %252  ;;  %v121_v3 = vsub.s32 0, %v120_v0 }
  0x82   :  { %450 = vperm.xlu1 %528, %v380_v48   ;;  %v319_v20 = vmul.f32 %v810_v9, %v253_v50 }
  0x83   :  { %v808_v8 = vrot.slane %v22_v6, %v121_v3 }
  0x85   :  { %v57_v52 = vpop.permute.xlu1 %56  ;;  %v265_v53 = vpop.permute.xlu0 %264  ;;  %v125_v39 = vmul.f32 %v808_v8, %v52_v49 }
  0x86   :  { %460 = vperm.xlu1 %528, %v382_v51   ;;  %v126_v11 = vmul.f32 %v808_v8, %v57_v52  ;;  %v322_v13 = vmul.f32 %v810_v9, %v265_v53 }
  0x89   :  { %v787_v54 = vpop.permute.xlu1 %66 }
  0x8a   :  { %v42_v55 = vpop.permute.xlu0 %41 }
  0x8b   :  { %v123_v17 = vmul.f32 %v808_v8, %v42_v55 }
  0x8d   :  { %v789_v56 = vpop.permute.xlu1 %76 }
  0x8e   :  { %v47_v57 = vpop.permute.xlu0 %46 }
  0x8f   :  { %v124_v35 = vmul.f32 %v808_v8, %v47_v57 }
  0x91   :  { %v791_v58 = vpop.permute.xlu1 %86 }
  0x92   :  { %v62_v59 = vpop.permute.xlu0 %61 }
  0x93   :  { %v127_v47 = vmul.f32 %v808_v8, %v62_v59 }
  0x95   :  { %v793_v60 = vpop.permute.xlu1 %96 }
  0x96   :  { %v795_v62 = vpop.permute.xlu0 %71 }
  0x99   :  { %v797_v63 = vpop.permute.xlu1 %106 }
  0x9a   :  { %v799_v1 = vpop.permute.xlu0 %81 }
  0x9d   :  { %v801_v2 = vpop.permute.xlu1 %116 }
  0x9e   :  { %v803_v5 = vpop.permute.xlu0 %91 }
  0xa1   :  { %v163_v7 = vpop.permute.xlu1 %162 }
  0xa2   :  { %v812_v10 = vpop.permute.xlu0 %101  ;;  %v236_v40 = vadd.f32 %v163_v7, %v124_v35 }
  0xa5   :  { %v173_v12 = vpop.permute.xlu1 %172 }
  0xa6   :  { %v238_v14 = vadd.f32 %v173_v12, %v126_v11  ;;  %v816_v15 = vpop.permute.xlu0 %111  ;;  %v128_v11 = vmul.f32 %v808_v8, %v787_v54 }
  0xa8   :  { %v338_v16 = vadd.f32 %v322_v13, %v238_v14 }
  0xa9   :  { %v183_v18 = vpop.permute.xlu1 %182 }
  0xaa   :  { %v158_v19 = vpop.permute.xlu0 %157  ;;  %v354_v3 = vmax.f32 %v338_v16, 0.0  ;;  %v240_v14 = vadd.f32 %v183_v18, %v128_v11  ;;  %v130_v18 = vmul.f32 %v808_v8, %v789_v56 }
  0xab   :  { %v235_v21 = vadd.f32 %v158_v19, %v123_v17 }
  0xad   :  { %v335_v22 = vadd.f32 %v319_v20, %v235_v21  ;;  %v193_v23 = vpop.permute.xlu1 %192 }
  0xae   :  { %v168_v24 = vpop.permute.xlu0 %167 }
  0xaf   :  { %v237_v42 = vadd.f32 %v168_v24, %v125_v39  ;;  %v351_v50 = vmax.f32 %v335_v22, 0.0  ;;  %v129_v22 = vmul.f32 %v808_v8, %v795_v62 }
  0xb1   :  { %v820_v25 = vpop.permute.xlu1 %202 }
  0xb2   :  { %v178_v26 = vpop.permute.xlu0 %177 }
  0xb3   :  { %v239_v53 = vadd.f32 %v178_v26, %v127_v47 }
  0xb5   :  { %v822_v27 = vpop.permute.xlu1 %212 }
  0xb6   :  { %v188_v28 = vpop.permute.xlu0 %187 }
  0xb9   :  { %v824_v29 = vpop.permute.xlu1 %222 }
  0xba   :  { %v826_v30 = vpop.permute.xlu0 %197 }
  0xbd   :  { %v828_v31 = vpop.permute.xlu1 %232 }
  0xbe   :  { %v830_v32 = vpop.permute.xlu0 %207 }
  0xc2   :  { %v257_v33 = vpop.permute.xlu1 %256  ;;  %v832_v34 = vpop.permute.xlu0 %217 }
  0xc3   :  { %v320_v36 = vmul.f32 %v810_v9, %v257_v33  ;;  %v241_v33 = vadd.f32 %v188_v28, %v129_v22  ;;  %v131_v28 = vmul.f32 %v808_v8, %v799_v1 }
  0xc5   :  { %v336_v43 = vadd.f32 %v320_v36, %v236_v40 }
  0xc6   :  { %v261_v37 = vpop.permute.xlu1 %260  ;;  %v836_v38 = vpop.permute.xlu0 %227 }
  0xc7   :  { %v321_v41 = vmul.f32 %v810_v9, %v261_v37  ;;  %v352_v52 = vmax.f32 %v336_v43, 0.0 }
  0xc9   :  { %v337_v46 = vadd.f32 %v321_v41, %v237_v42  ;;  %v242_v42 = vadd.f32 %v193_v23, %v130_v18  ;;  %v132_v23 = vmul.f32 %v808_v8, %v791_v58 }
  0xca   :  { %v269_v44 = vpop.permute.xlu1 %268  ;;  %v386_v45 = vpop.permute.xlu0 %385 }
  0xcb   :  { %v323_v48 = vmul.f32 %v810_v9, %v269_v44  ;;  %v463_v57 = vmul.f32 %v386_v45, %v351_v50  ;;  %v353_v61 = vmax.f32 %v337_v46, 0.0  ;;  %v243_v50 = vadd.f32 %v826_v30, %v131_v28 }
  0xcc   :  { %v133_v30 = vmul.f32 %v808_v8, %v803_v5 }
  0xcd   :  { %v339_v0 = vadd.f32 %v323_v48, %v239_v53 }
  0xce   :  { %v396_v51 = vpop.permute.xlu0 %395 }
  0xcf   :  { %v391_v55 = vpop.permute.xlu1 %390  ;;  %v465_v4 = vmul.f32 %v396_v51, %v353_v61  ;;  %v355_v19 = vmax.f32 %v339_v0, 0.0 }
  0xd0   :  { %v464_v49 = vmul.f32 %v391_v55, %v352_v52 }
  0xd2   :  { %v479_v6 = vadd.f32 %v464_v49, %v463_v57  ;;  %v401_v7 = vpop.permute.xlu0 %400  ;;  %v244_v49 = vadd.f32 %v820_v25, %v132_v23  ;;  %v134_v25 = vmul.f32 %v808_v8, %v793_v60 }
  0xd3   :  { %v466_v12 = vmul.f32 %v401_v7, %v354_v3 }
  0xd4   :  { %v480_v59 = vadd.f32 %v479_v6, %v465_v4  ;;  %v273_v13 = vpop.permute.xlu1 %272 }
  0xd5   :  { %v324_v17 = vmul.f32 %v810_v9, %v273_v13 }
  0xd6   :  { %v481_v20 = vadd.f32 %v480_v59, %v466_v12  ;;  %v406_v21 = vpop.permute.xlu0 %405  ;;  %v245_v12 = vadd.f32 %v830_v32, %v133_v30  ;;  %v135_v32 = vmul.f32 %v808_v8, %v812_v10  ;;  %v136_v10 = vmul.f32 %v808_v8, %v797_v63 }
  0xd7   :  { %v340_v24 = vadd.f32 %v324_v17, %v240_v14  ;;  %v467_v16 = vmul.f32 %v406_v21, %v355_v19  ;;  %v246_v21 = vadd.f32 %v822_v27, %v134_v25 }
  0xd8   :  { %v277_v26 = vpop.permute.xlu1 %276 }
  0xd9   :  { %v482_v35 = vadd.f32 %v481_v20, %v467_v16  ;;  %v325_v36 = vmul.f32 %v810_v9, %v277_v26  ;;  %v356_v54 = vmax.f32 %v340_v24, 0.0 }
  0xda   :  { %v411_v37 = vpop.permute.xlu0 %410 }
  0xdb   :  { %v341_v39 = vadd.f32 %v325_v36, %v241_v33  ;;  %v468_v40 = vmul.f32 %v411_v37, %v356_v54  ;;  %v247_v36 = vadd.f32 %v832_v34, %v135_v32 }
  0xdc   :  { %v281_v41 = vpop.permute.xlu1 %280 }
  0xdd   :  { %v483_v43 = vadd.f32 %v482_v35, %v468_v40  ;;  %v326_v44 = vmul.f32 %v810_v9, %v281_v41  ;;  %v357_v62 = vmax.f32 %v341_v39, 0.0 }
  0xde   :  { %v416_v45 = vpop.permute.xlu0 %415 }
  0xdf   :  { %v342_v46 = vadd.f32 %v326_v44, %v242_v42  ;;  %v469_v47 = vmul.f32 %v416_v45, %v357_v62  ;;  %v137_v62 = vmul.f32 %v808_v8, %v816_v15 }
  0xe0   :  { %v285_v48 = vpop.permute.xlu1 %284 }
  0xe1   :  { %v484_v51 = vadd.f32 %v483_v43, %v469_v47  ;;  %v327_v56 = vmul.f32 %v810_v9, %v285_v48  ;;  %v358_v52 = vmax.f32 %v342_v46, 0.0  ;;  %v248_v47 = vadd.f32 %v824_v29, %v136_v10 }
  0xe2   :  { %v421_v53 = vpop.permute.xlu0 %420  ;;  %v249_v48 = vadd.f32 %v836_v38, %v137_v62 }
  0xe3   :  { %v343_v55 = vadd.f32 %v327_v56, %v243_v50  ;;  %v470_v57 = vmul.f32 %v421_v53, %v358_v52  ;;  %v138_v50 = vmul.f32 %v808_v8, %v801_v2 }
  0xe4   :  { %v289_v61 = vpop.permute.xlu1 %288 }
  0xe5   :  { %v485_v0 = vadd.f32 %v484_v51, %v470_v57  ;;  %v328_v1 = vmul.f32 %v810_v9, %v289_v61  ;;  %v359_v3 = vmax.f32 %v343_v55, 0.0  ;;  %v250_v15 = vadd.f32 %v828_v31, %v138_v50 }
  0xe6   :  { %v426_v4 = vpop.permute.xlu0 %425  ;;  %v501_v31 = vstv %s902_s4 }
  0xe7   :  { %v344_v6 = vadd.f32 %v328_v1, %v244_v49  ;;  %v471_v7 = vmul.f32 %v426_v4, %v359_v3 }
  0xe8   :  { %v293_v11 = vpop.permute.xlu1 %292 }
  0xe9   :  { %v486_v59 = vadd.f32 %v485_v0, %v471_v7  ;;  %v329_v58 = vmul.f32 %v810_v9, %v293_v11  ;;  %v360_v13 = vmax.f32 %v344_v6, 0.0 }
  0xea   :  { %v431_v14 = vpop.permute.xlu0 %430 }
  0xeb   :  { %v345_v17 = vadd.f32 %v329_v58, %v245_v12  ;;  %v472_v19 = vmul.f32 %v431_v14, %v360_v13 }
  0xec   :  { %v297_v20 = vpop.permute.xlu1 %296 }
  0xed   :  { %v487_v22 = vadd.f32 %v486_v59, %v472_v19  ;;  %v330_v5 = vmul.f32 %v810_v9, %v297_v20  ;;  %v361_v24 = vmax.f32 %v345_v17, 0.0 }
  0xee   :  { %v436_v16 = vpop.permute.xlu0 %435 }
  0xef   :  { %v346_v26 = vadd.f32 %v330_v5, %v246_v21  ;;  %v473_v33 = vmul.f32 %v436_v16, %v361_v24 }
  0xf0   :  { %v301_v35 = vpop.permute.xlu1 %300 }
  0xf1   :  { %v488_v54 = vadd.f32 %v487_v22, %v473_v33  ;;  %v331_v60 = vmul.f32 %v810_v9, %v301_v35  ;;  %v362_v37 = vmax.f32 %v346_v26, 0.0 }
  0xf2   :  { %v441_v18 = vpop.permute.xlu0 %440 }
  0xf3   :  { %v347_v39 = vadd.f32 %v331_v60, %v247_v36  ;;  %v474_v27 = vmul.f32 %v441_v18, %v362_v37 }
  0xf4   :  { %v305_v40 = vpop.permute.xlu1 %304 }
  0xf5   :  { %v489_v41 = vadd.f32 %v488_v54, %v474_v27  ;;  %v363_v42 = vmax.f32 %v347_v39, 0.0  ;;  %v332_v34 = vmul.f32 %v810_v9, %v305_v40 }
  0xf6   :  { %v446_v43 = vpop.permute.xlu0 %445 }
  0xf7   :  { %v475_v44 = vmul.f32 %v446_v43, %v363_v42  ;;  %v348_v51 = vadd.f32 %v332_v34, %v248_v47 }
  0xf8   :  { %v309_v45 = vpop.permute.xlu1 %308 }
  0xf9   :  { %v490_v28 = vadd.f32 %v489_v41, %v475_v44  ;;  %v333_v46 = vmul.f32 %v810_v9, %v309_v45  ;;  %v364_v55 = vmax.f32 %v348_v51, 0.0 }
  0xfa   :  { %v456_v49 = vpop.permute.xlu0 %455 }
  0xfb   :  { %v349_v56 = vadd.f32 %v333_v46, %v249_v48 }
  0xfc   :  { %v313_v52 = vpop.permute.xlu1 %312 }
  0xfd   :  { %v334_v63 = vmul.f32 %v810_v9, %v313_v52  ;;  %v365_v53 = vmax.f32 %v349_v56, 0.0 }
  0xff   :  { %v350_v23 = vadd.f32 %v334_v63, %v250_v15  ;;  %v477_v0 = vmul.f32 %v456_v49, %v365_v53 }
 0x101   :  { %v451_v57 = vpop.permute.xlu1 %450  ;;  %v366_v1 = vmax.f32 %v350_v23, 0.0 }
 0x102   :  { %v476_v61 = vmul.f32 %v451_v57, %v364_v55 }
 0x104   :  { %v491_v29 = vadd.f32 %v490_v28, %v476_v61 }
 0x105   :  { %v461_v38 = vpop.permute.xlu1 %460 }
 0x106   :  { %v478_v3 = vmul.f32 %v461_v38, %v366_v1  ;;  %v492_v4 = vadd.f32 %v491_v29, %v477_v0 }
 0x108   :  { %v493_v2 = vadd.f32 %v492_v4, %v478_v3 }
 0x10a   :  { %v494_v8 = vrot.slane %v493_v2, 4 }
 0x10c   :  { %v495_v30 = vadd.f32 %v494_v8, %v493_v2 }
 0x10e   :  { %v496_v6 = vrot.slane %v495_v30, 2 }
 0x110   :  { %v497_v7 = vadd.f32 %v496_v6, %v495_v30 }
 0x112   :  { %v498_v9 = vrot.slane %v497_v7, 1 }
 0x114   :  { %v499_v11 = vadd.f32 %v498_v9, %v497_v7 }
 0x116   :  { %v502_v12 = vadd.f32 %v501_v31, %v499_v11 }
 0x118   :  { %529 = vtanh.f32 %v502_v12 }
 0x122   :  { %v530_v59 = vpop.eup %529 }
 0x123   :  { %504 = vst [vmem:[#allocation3] sm:$0x1] %v530_v59 }
 0x124   :  { %542 = shalt.err (!%p539_p4)
}
 0x125   :  { %s543_s4 = scalar_lea.hbm %s903_s5, 16 }
 0x126   :  { %p544_p5 = scmp.ne.s32.totalorder %s903_s5, %s543_s4  ;;  %p547_p6 = scmp.lt.u32.totalorder %s543_s4, %s903_s5 }
 0x128   :  { %p549_p7 = pnand %p547_p6, %p544_p5 }
 0x12a   :  { %552 = shalt.err (!%p549_p7)
}
 0x12b   :  { %514 = dma.vmem_to_hbm [thread:$0]  %s512_s12, 16, %s903_s5, [#allocation4]  }
 0x12c   :  { %553 = dma.done.wait [#allocation4], 16  }
 0x12d   :  { %554 = vsyncadd [#allocation4], 4294967280 }
 0x12e   :  { %518 = vsyncpa [#allocation4], 1 }

</bundles_post_ra>
